<compile_context>
chip_gen: v7x
topology: tpu7x:2x2x1
jax: 0.10.0
libtpu: 0.0.40
codegen_flags: <defaults>
</compile_context>

<pallas_src>
import jax
import jax.numpy as jnp
from jax.experimental import pallas as pl
from jax.experimental.pallas import tpu as pltpu

BN_EPS = 1e-5


def _non_local_kernel(x_ref, wproj_ref, bproj_ref, affine_ref, o_ref):
    # x_ref block: (1, C, N)  -> work on (C, N) in float32 (lane axis = N)
    x = x_ref[0].astype(jnp.float32)                       # (C, N)
    n = x.shape[1]
    wproj = wproj_ref[...].astype(jnp.float32)             # (C, 3): [g, theta, phi]

    # 1x1 convs (C -> 1) as VPU broadcast-multiply + sublane reduce over C.
    g_x = jnp.sum(x * wproj[:, 0:1], axis=0, keepdims=True) + bproj_ref[0]      # (1, N)
    theta_x = jnp.sum(x * wproj[:, 1:2], axis=0, keepdims=True) + bproj_ref[1]  # (1, N)
    phi_x = jnp.sum(x * wproj[:, 2:3], axis=0, keepdims=True) + bproj_ref[2]    # (1, N)

    # Rank-1 attention:  y = (theta @ phi^T / N) @ g  ==  theta * (phi . g) / N
    s = jnp.sum(phi_x * g_x, axis=1, keepdims=True) * (1.0 / n)  # (1, 1)
    y = theta_x * s                                              # (1, N)

    # Folded W-conv + BatchNorm (eval mode): per-channel scale/shift,
    # broadcast along the lane axis; fused with the residual add.
    scale = affine_ref[:, 0:1]                              # (C, 1)
    shift = affine_ref[:, 1:2]                              # (C, 1)
    o_ref[0] = (x + scale * y + shift).astype(o_ref.dtype)


@jax.jit
def non_local_forward(x_nchw, params):
    """x_nchw: (B, C, H, W) float32; params: tuple of 2-D parameter arrays."""
    wg, bg, wth, bth, wph, bph, wW, bW, gamma, beta, rmean, rvar = params
    B, C, H, W = x_nchw.shape
    N = H * W

    # Free reshape (no transpose / data movement): (B, C, H, W) -> (B, C, N)
    x = x_nchw.reshape(B, C, N)

    # Fuse the three projection weights into one (C, 3) matrix and the
    # scalar biases into an SMEM-resident (3,) vector.
    wproj = jnp.concatenate([wg, wth, wph], axis=1).astype(jnp.float32)       # (C, 3)
    bproj = jnp.stack([bg[0, 0], bth[0, 0], bph[0, 0]]).astype(jnp.float32)   # (3,)

    # Fold W 1x1-conv (1 -> C) + eval-mode BatchNorm2d into scale/shift (C, 2).
    inv_std = jax.lax.rsqrt(rvar + BN_EPS)                                    # (1, C)
    scale = (wW * gamma * inv_std).reshape(C, 1)
    shift = ((bW - rmean) * gamma * inv_std + beta).reshape(C, 1)
    affine = jnp.concatenate([scale, shift], axis=1).astype(jnp.float32)      # (C, 2)

    # grid=(B,) with "parallel": shards batch across TensorCores on v7x,
    # neutral on v5e/v6e.  (For large B with tiny N*C, several batch
    # elements per step would amortize the ~0.35 us/step overhead.)
    out = pl.pallas_call(
        _non_local_kernel,
        out_shape=jax.ShapeDtypeStruct((B, C, N), x.dtype),
        grid=(B,),
        in_specs=[
            pl.BlockSpec((1, C, N), lambda b: (b, 0, 0)),
            pl.BlockSpec((C, 3), lambda b: (0, 0)),
            pl.BlockSpec(memory_space=pltpu.MemorySpace.SMEM),
            pl.BlockSpec((C, 2), lambda b: (0, 0)),
        ],
        out_specs=pl.BlockSpec((1, C, N), lambda b: (b, 0, 0)),
        compiler_params=pltpu.CompilerParams(
            dimension_semantics=("parallel",)),
    )(x, wproj, bproj, affine)

    return out.reshape(B, C, H, W)


def make_params(key, C, *, bn_gamma=0.0, bn_beta=0.0):
    """Deterministic parameter init.  Conv weights stored as (C_in, C_out)."""
    ks = jax.random.split(key, 8)
    scale = 0.1
    wg = scale * jax.random.normal(ks[0], (C, 1), jnp.float32)
    bg = scale * jax.random.normal(ks[1], (1, 1), jnp.float32)
    wth = scale * jax.random.normal(ks[2], (C, 1), jnp.float32)
    bth = scale * jax.random.normal(ks[3], (1, 1), jnp.float32)
    wph = scale * jax.random.normal(ks[4], (C, 1), jnp.float32)
    bph = scale * jax.random.normal(ks[5], (1, 1), jnp.float32)
    wW = scale * jax.random.normal(ks[6], (1, C), jnp.float32)
    bW = scale * jax.random.normal(ks[7], (1, C), jnp.float32)
    # BatchNorm2d: module inits weight (gamma) = 0, bias (beta) = 0;
    # running stats at their defaults (mean=0, var=1), eval-mode semantics.
    gamma = jnp.full((1, C), bn_gamma, jnp.float32)
    beta = jnp.full((1, C), bn_beta, jnp.float32)
    rmean = jnp.zeros((1, C), jnp.float32)
    rvar = jnp.ones((1, C), jnp.float32)
    return (wg, bg, wth, bth, wph, bph, wW, bW, gamma, beta, rmean, rvar)


def ref_forward(x_nchw, params):
    """Pure-JAX reference mirroring the PyTorch forward exactly
    (explicit (N, N) attention matrix, no rank-1 reassociation)."""
    wg, bg, wth, bth, wph, bph, wW, bW, gamma, beta, rmean, rvar = params
    B, C, H, W = x_nchw.shape
    N = H * W
    x = jnp.transpose(x_nchw, (0, 2, 3, 1)).reshape(B, N, C).astype(jnp.float32)
    g = x @ wg + bg            # (B, N, 1)
    th = x @ wth + bth         # (B, N, 1)
    ph = x @ wph + bph         # (B, N, 1)
    f = jnp.einsum('bni,bmi->bnm', th, ph) / N
    y = jnp.einsum('bnm,bmi->bni', f, g)
    w_y = y @ wW + bW
    w_y = (w_y - rmean) / jnp.sqrt(rvar + BN_EPS) * gamma + beta
    z = w_y + x
    return jnp.transpose(z.reshape(B, H, W, C), (0, 3, 1, 2))


if __name__ == "__main__":
    key = jax.random.PRNGKey(0)
    kx, kp = jax.random.split(key)

    B, C, H, W = 2, 4, 16, 16
    x = jax.random.normal(kx, (B, C, H, W), jnp.float32)

    # Faithful parameters (BatchNorm gamma=beta=0, exactly as the module's __init__).
    params = make_params(kp, C)
    z = non_local_forward(x, params)
    jax.block_until_ready(z)
    # With gamma=beta=0 the W-branch is exactly zero -> z == x.
    assert jnp.allclose(z, x, atol=1e-5), "faithful-init output should equal input"

    # Extra internal check with non-zero BN affine so the whole attention path
    # (projections, rank-1 attention, folded W-conv+BN, residual) is exercised
    # against the explicit-f reference.
    params_dbg = make_params(kp, C, bn_gamma=1.0, bn_beta=0.1)
    z_dbg = non_local_forward(x, params_dbg)
    z_ref = ref_forward(x, params_dbg)
    jax.block_until_ready(z_dbg)
    assert jnp.allclose(z_dbg, z_ref, atol=1e-4, rtol=1e-4), "kernel != reference"

    print("KERNEL_OK")
</pallas_src>

<mosaic_0001>
module attributes {stable_mosaic.version = 11 : i64} {
  func.func @_non_local_kernel(%arg0: i32, %arg1: memref<1x4x256xf32, #tpu.memory_space<vmem>>, %arg2: memref<4x3xf32, #tpu.memory_space<vmem>>, %arg3: memref<3xf32, #tpu.memory_space<smem>>, %arg4: memref<4x2xf32, #tpu.memory_space<vmem>>, %arg5: memref<1x4x256xf32, #tpu.memory_space<vmem>>) attributes {dimension_semantics = [#tpu.dimension_semantics<parallel>], iteration_bounds = array<i64: 2>, scalar_prefetch = 0 : i64, scratch_operands = 0 : i64, tpu.core_type = #tpu.core_type<tc>, window_params = [{transform_indices = @transform_0, window_bounds = array<i64: 1, 4, 256>}, {pipeline_mode = #tpu.pipeline_mode<synchronous>, transform_indices = @transform_1, window_bounds = array<i64: 4, 3>}, {transform_indices = @transform_2, window_bounds = array<i64: 3>}, {pipeline_mode = #tpu.pipeline_mode<synchronous>, transform_indices = @transform_3, window_bounds = array<i64: 4, 2>}, {transform_indices = @transform_4, window_bounds = array<i64: 1, 4, 256>}]} {
    %c0 = arith.constant 0 : index
    %c0_0 = arith.constant 0 : index
    %c0_1 = arith.constant 0 : index
    %0 = vector.load %arg1[%c0, %c0_0, %c0_1] : memref<1x4x256xf32, #tpu.memory_space<vmem>>, vector<1x4x256xf32>
    %1 = vector.shape_cast %0 : vector<1x4x256xf32> to vector<4x256xf32>
    %c0_2 = arith.constant 0 : index
    %c0_3 = arith.constant 0 : index
    %2 = vector.load %arg2[%c0_2, %c0_3] : memref<4x3xf32, #tpu.memory_space<vmem>>, vector<4x3xf32>
    %3 = vector.extract_strided_slice %2 {offsets = [0, 0], sizes = [4, 1], strides = [1, 1]} : vector<4x3xf32> to vector<4x1xf32>
    %4 = vector.broadcast %3 : vector<4x1xf32> to vector<4x256xf32>
    %5 = arith.mulf %1, %4 : vector<4x256xf32>
    %cst = arith.constant dense<0.000000e+00> : vector<256xf32>
    %6 = vector.multi_reduction <add>, %5, %cst [0] : vector<4x256xf32> to vector<256xf32>
    %7 = vector.shape_cast %6 : vector<256xf32> to vector<1x256xf32>
    %c0_4 = arith.constant 0 : index
    %8 = memref.load %arg3[%c0_4] : memref<3xf32, #tpu.memory_space<smem>>
    %9 = vector.broadcast %8 : f32 to vector<1x256xf32>
    %10 = arith.addf %7, %9 : vector<1x256xf32>
    %11 = vector.extract_strided_slice %2 {offsets = [0, 1], sizes = [4, 1], strides = [1, 1]} : vector<4x3xf32> to vector<4x1xf32>
    %12 = vector.broadcast %11 : vector<4x1xf32> to vector<4x256xf32>
    %13 = arith.mulf %1, %12 : vector<4x256xf32>
    %cst_5 = arith.constant dense<0.000000e+00> : vector<256xf32>
    %14 = vector.multi_reduction <add>, %13, %cst_5 [0] : vector<4x256xf32> to vector<256xf32>
    %15 = vector.shape_cast %14 : vector<256xf32> to vector<1x256xf32>
    %c1 = arith.constant 1 : index
    %16 = memref.load %arg3[%c1] : memref<3xf32, #tpu.memory_space<smem>>
    %17 = vector.broadcast %16 : f32 to vector<1x256xf32>
    %18 = arith.addf %15, %17 : vector<1x256xf32>
    %19 = vector.extract_strided_slice %2 {offsets = [0, 2], sizes = [4, 1], strides = [1, 1]} : vector<4x3xf32> to vector<4x1xf32>
    %20 = vector.broadcast %19 : vector<4x1xf32> to vector<4x256xf32>
    %21 = arith.mulf %1, %20 : vector<4x256xf32>
    %cst_6 = arith.constant dense<0.000000e+00> : vector<256xf32>
    %22 = vector.multi_reduction <add>, %21, %cst_6 [0] : vector<4x256xf32> to vector<256xf32>
    %23 = vector.shape_cast %22 : vector<256xf32> to vector<1x256xf32>
    %c2 = arith.constant 2 : index
    %24 = memref.load %arg3[%c2] : memref<3xf32, #tpu.memory_space<smem>>
    %25 = vector.broadcast %24 : f32 to vector<1x256xf32>
    %26 = arith.addf %23, %25 : vector<1x256xf32>
    %27 = arith.mulf %26, %10 : vector<1x256xf32>
    %cst_7 = arith.constant dense<0.000000e+00> : vector<1xf32>
    %28 = vector.multi_reduction <add>, %27, %cst_7 [1] : vector<1x256xf32> to vector<1xf32>
    %29 = vector.shape_cast %28 : vector<1xf32> to vector<1x1xf32>
    %cst_8 = arith.constant 3.906250e-03 : f32
    %30 = vector.broadcast %cst_8 : f32 to vector<1x1xf32>
    %31 = arith.mulf %29, %30 : vector<1x1xf32>
    %32 = vector.broadcast %31 : vector<1x1xf32> to vector<1x256xf32>
    %33 = arith.mulf %18, %32 : vector<1x256xf32>
    %c0_9 = arith.constant 0 : index
    %c0_10 = arith.constant 0 : index
    %34 = vector.load %arg4[%c0_9, %c0_10] : memref<4x2xf32, #tpu.memory_space<vmem>>, vector<4x1xf32>
    %c0_11 = arith.constant 0 : index
    %c1_12 = arith.constant 1 : index
    %35 = vector.load %arg4[%c0_11, %c1_12] : memref<4x2xf32, #tpu.memory_space<vmem>>, vector<4x1xf32>
    %36 = vector.broadcast %34 : vector<4x1xf32> to vector<4x256xf32>
    %37 = vector.broadcast %33 : vector<1x256xf32> to vector<4x256xf32>
    %38 = arith.mulf %36, %37 : vector<4x256xf32>
    %39 = arith.addf %1, %38 : vector<4x256xf32>
    %40 = vector.broadcast %35 : vector<4x1xf32> to vector<4x256xf32>
    %41 = arith.addf %39, %40 : vector<4x256xf32>
    %c0_13 = arith.constant 0 : index
    %c0_14 = arith.constant 0 : index
    %c0_15 = arith.constant 0 : index
    %42 = vector.load %arg5[%c0_13, %c0_14, %c0_15] : memref<1x4x256xf32, #tpu.memory_space<vmem>>, vector<1x4x256xf32>
    %43 = vector.shape_cast %42 : vector<1x4x256xf32> to vector<4x256xf32>
    %44 = vector.shape_cast %41 : vector<4x256xf32> to vector<1x4x256xf32>
    tpu.vector_store %arg5[%c0_13, %c0_14, %c0_15], %44 {strides = array<i32>} : memref<1x4x256xf32, #tpu.memory_space<vmem>>, vector<1x4x256xf32>,
    return
  }
  func.func @transform_0(%arg0: i32) -> (i32, i32, i32) {
    %c0_i32 = arith.constant 0 : i32
    %c0_i32_0 = arith.constant 0 : i32
    %c0_i32_1 = arith.constant 0 : i32
    return %arg0, %c0_i32, %c0_i32_0 : i32, i32, i32
  }
  func.func @transform_1(%arg0: i32) -> (i32, i32) {
    %c0_i32 = arith.constant 0 : i32
    %c0_i32_0 = arith.constant 0 : i32
    %c0_i32_1 = arith.constant 0 : i32
    return %c0_i32, %c0_i32_0 : i32, i32
  }
  func.func @transform_2(%arg0: i32) -> i32 {
    %c0_i32 = arith.constant 0 : i32
    %c0_i32_0 = arith.constant 0 : i32
    return %c0_i32 : i32
  }
  func.func @transform_3(%arg0: i32) -> (i32, i32) {
    %c0_i32 = arith.constant 0 : i32
    %c0_i32_0 = arith.constant 0 : i32
    %c0_i32_1 = arith.constant 0 : i32
    return %c0_i32, %c0_i32_0 : i32, i32
  }
  func.func @transform_4(%arg0: i32) -> (i32, i32, i32) {
    %c0_i32 = arith.constant 0 : i32
    %c0_i32_0 = arith.constant 0 : i32
    %c0_i32_1 = arith.constant 0 : i32
    return %arg0, %c0_i32, %c0_i32_0 : i32, i32, i32
  }
}

</mosaic_0001>

<bundles_post_ra>
// kernel: non_local_forward.1
= control target key start
LH: loop header
LB: loop body
LE: loop exit
PB: predicated region body
PF: predicated region fallthrough
CT: control target
= control target key end

     0   :  { %9 = vsyncpa [#allocation3], 0  ;;  %s518_s15 = smov 0   ;;  %s588_s0 = inlined_call_operand.vmem [shape: f32[2,4,256], index: 0, kind: input, shape index: {}]   ;;  %s589_s1 = inlined_call_operand.vmem [shape: f32[4,3], index: 1, kind: input, shape index: {}]   ;;  %s590_s2 = inlined_call_operand.vmem [shape: f32[3], index: 2, kind: input, shape index: {}]   ;;  %s591_s3 = inlined_call_operand.vmem [shape: f32[4,2], index: 3, kind: input, shape index: {}]   ;;  %s592_s4 = inlined_call_operand.vmem [shape: f32[2,4,256], index: 4, kind: output, shape index: {}]  }
   0x1 LB: > { %s524_s16 = sadd.s32 4294967295, %s486_s15   ;;  %p418_p0 = scmp.ge.s32.totalorder %s486_s15, 1  ;;  %s486_s15 = sphi %s518_s15, %s15_s15  }
   0x2   : > { %p135_p1 = scmp.lt.s32.totalorder %s486_s15, 3  ;;  %s151_s19 = sshll.u32 %s590_s2, 4  ;;  %s152_s19 = int_to_ptr.vmem [resolvable:$true] %s151_s19 }
   0x3   : > { %p441_p3 = scmp.eq.s32.totalorder %s524_s16, 0  ;;  %s461_s21 = scalar_lea.vmem %s152_s19, 16 }
   0x4   : > { %p531_p2 = pnand %p418_p0, %p135_p1  ;;  %p462_p6 = scmp.ne.s32.totalorder %s152_s19, %s461_s21 }
   0x5   : > { %p469_p10 = scmp.lt.s32.totalorder %s152_s19, %s152_s19  ;;  %p470_p11 = scmp.lt.s32.totalorder %s461_s21, %s461_s21 }
   0x6   : > { %p437_p4 = pneg %p531_p2 }
   0x7   : > { %p471_p12 = por %p470_p11, %p469_p10 }
   0x8   : > { %p438_p5 = pnand %p441_p3, %p437_p4 }
   0xa   : > { %p463_p7 = pneg %p438_p5 }
   0xc   : > { %p464_p8 = pnand %p463_p7, %p462_p6 }
   0xe   : > { %p465_p9 = pneg %p464_p8 }
  0x10   : > { %p472_p13 = pnand %p471_p12, %p465_p9 }
  0x12   : > { %475 = shalt.err (!%p472_p13)
}
  0x13   : > { %s488_s22 = smov [#allocation2]   ;;  %175 = sbr.rel (%p531_p2) target bundleno = 344 (0x158), region = 36 }
  0x14   : > { %440 = dma.vmem_to_smem (!%p438_p5), %s152_s19, 16, %s488_s22, [#allocation3]  }
  0x1a   : > { %481 = dma.done.wait (%p441_p3), [#allocation3], 16  }
  0x1b   : > { %483 = vsyncadd (%p441_p3), [#allocation3], 4294967280 }
  0x1c   : > { %181 = sfence }
  0x1d   : > { %v213_v0 = vld [vmem:[%s589_s1] sm:$0xf]  ;;  %v489_v1 = vmov 0   ;;  %v490_v2 = vmov 1   ;;  %v491_v3 = vmov 2   ;;  %p202_p0 = scmp.lt.s32.totalorder %s524_s16, 1  ;;  %v221_v7 = vlaneseq }
  0x1e   : > { %456 = vset.pattern.permute.xlu0 %v489_v1  ;;  %458 = vset.pattern.permute.xlu1 %v490_v2  ;;  %v323_v4 = vld [vmem:[%s591_s3] sm:$0xf]  ;;  %v492_v5 = vmov 839922192   ;;  %vm230_vm0 = vcmask 1043456   ;;  %s428_s5 = sld [smem:[#allocation2 + $0x2]] }
  0x1f   : > { %216 = vperm.xlu0 %456, %v213_v0   ;;  %250 = vperm.xlu1 %458, %v213_v0   ;;  %v219_v6 = vunpack.c.l.s4 %v492_v5  ;;  %s595_s16 = smov (!%p202_p0, %s524_s16), 1  ;;  %v222_v9 = vshrl.u32 %v221_v7, 7  ;;  %s245_s6 = sld [smem:[#allocation2]] }
  0x20   : > { %s431_s27 = sshll.u32 %s595_s16, 3  ;;  %s427_s7 = sld [smem:[#allocation2 + $0x1]] }
  0x21   : > { %v220_v8 = vunpack.c.0.s8 %v219_v6  ;;  %s206_s30 = scalar_lea.vmem %s588_s0, %s431_s27  ;;  %s211_s10 = scalar_lea.vmem %s592_s4, %s431_s27 }
  0x22   : > { %v564_v12 = vld [vmem:[%s206_s30] sm:$0xff] }
  0x23   : > { %457 = vset.pattern.permute.xlu0 %v491_v3  ;;  %v557_v10 = vsub.s32 %v220_v8, %v222_v9 }
  0x24   : > { %283 = vperm.xlu0 %457, %v213_v0   ;;  %v312_v49 = vstv %s428_s5 }
  0x25   : > { %v246_v54 = vstv %s245_s6 }
  0x28   : > { %459 = vset.pattern.permute.xlu0 %v489_v1 }
  0x29   : > { %326 = vperm.xlu0 %459, %v323_v4  }
  0x2d   : > { %460 = vset.pattern.permute.xlu0 %v490_v2 }
  0x2e   : > { %337 = vperm.xlu0 %460, %v323_v4  }
  0x9e   : > { %v217_v11 = vpop.permute.xlu0 %216  ;;  %v251_v13 = vpop.permute.xlu1 %250 }
  0x9f   : > { %v224_v14 = vrot.slane %v217_v11, %v557_v10  ;;  %v258_v15 = vrot.slane %v251_v13, %v557_v10  ;;  %v279_v13 = vstv %s427_s7 }
  0xa1   : > { %v226_v16 = vmul.f32 %v224_v14, %v564_v12  ;;  %v260_v17 = vmul.f32 %v258_v15, %v564_v12 }
  0xa3   : > { %v228_v18 = vcombine.high %v226_v16, %v226_v16  ;;  %v231_v19 = vsel %vm230_vm0, %v226_v16, 0.0  ;;  %v284_v20 = vpop.permute.xlu0 %283  ;;  %v262_v21 = vcombine.high %v260_v17, %v260_v17  ;;  %v264_v22 = vsel %vm230_vm0, %v260_v17, 0.0 }
  0xa4   : > { %v232_v23 = vrot.slane %v231_v19, 4  ;;  %v291_v24 = vrot.slane %v284_v20, %v557_v10  ;;  %v265_v63 = vrot.slane %v264_v22, 4 }
  0xa5   : > { %v238_v25 = vsel %vm230_vm0, %v228_v18, 0.0  ;;  %v271_v26 = vsel %vm230_vm0, %v262_v21, 0.0 }
  0xa6   : > { %v233_v27 = vadd.f32 %v232_v23, %v231_v19  ;;  %v239_v28 = vrot.slane %v238_v25, 4  ;;  %v293_v29 = vmul.f32 %v291_v24, %v564_v12  ;;  %v272_v0 = vrot.slane %v271_v26, 4 }
  0xa7   : > { %v266_v1 = vadd.f32 %v265_v63, %v264_v22 }
  0xa8   : > { %v234_v30 = vrot.slane %v233_v27, 2  ;;  %v240_v31 = vadd.f32 %v239_v28, %v238_v25  ;;  %v295_v32 = vcombine.high %v293_v29, %v293_v29  ;;  %v297_v33 = vsel %vm230_vm0, %v293_v29, 0.0  ;;  %v327_v14 = vpop.permute.xlu0 %326 }
  0xa9   : > { %v298_v34 = vrot.slane %v297_v33, 4  ;;  %v273_v2 = vadd.f32 %v272_v0, %v271_v26  ;;  %v267_v3 = vrot.slane %v266_v1, 2 }
  0xaa   : > { %v241_v35 = vrot.slane %v240_v31, 2  ;;  %v304_v36 = vsel %vm230_vm0, %v295_v32, 0.0  ;;  %v235_v37 = vadd.f32 %v234_v30, %v233_v27 }
  0xab   : > { %v299_v38 = vadd.f32 %v298_v34, %v297_v33  ;;  %v305_v39 = vrot.slane %v304_v36, 4  ;;  %v274_v4 = vrot.slane %v273_v2, 2  ;;  %v268_v5 = vadd.f32 %v267_v3, %v266_v1 }
  0xac   : > { %v242_v40 = vadd.f32 %v241_v35, %v240_v31  ;;  %v236_v45 = vrot.slane %v235_v37, 1 }
  0xad   : > { %v300_v41 = vrot.slane %v299_v38, 2  ;;  %v306_v42 = vadd.f32 %v305_v39, %v304_v36  ;;  %v275_v6 = vadd.f32 %v274_v4, %v273_v2  ;;  %v269_v7 = vrot.slane %v268_v5, 1  ;;  %v338_v21 = vpop.permute.xlu0 %337 }
  0xae   : > { %v243_v46 = vrot.slane %v242_v40, 1  ;;  %v237_v50 = vadd.f32 %v236_v45, %v235_v37  ;;  %v345_v25 = vrot.slane %v338_v21, %v557_v10 }
  0xaf   : > { %v301_v43 = vadd.f32 %v300_v41, %v299_v38  ;;  %v307_v44 = vrot.slane %v306_v42, 2  ;;  %v276_v8 = vrot.slane %v275_v6, 1  ;;  %v270_v9 = vadd.f32 %v269_v7, %v268_v5 }
  0xb0   : > { %v244_v51 = vadd.f32 %v243_v46, %v242_v40  ;;  %v247_v57 = vadd.f32 %v246_v54, %v237_v50 }
  0xb1   : > { %v302_v47 = vrot.slane %v301_v43, 1  ;;  %v308_v48 = vadd.f32 %v307_v44, %v306_v42  ;;  %v277_v11 = vadd.f32 %v276_v8, %v275_v6  ;;  %v280_v16 = vadd.f32 %v279_v13, %v270_v9 }
  0xb2   : > { %v248_v58 = vadd.f32 %v246_v54, %v244_v51 }
  0xb3   : > { %v303_v52 = vadd.f32 %v302_v47, %v301_v43  ;;  %v309_v53 = vrot.slane %v308_v48, 1  ;;  %v281_v17 = vadd.f32 %v279_v13, %v277_v11 }
  0xb5   : > { %v310_v55 = vadd.f32 %v309_v53, %v308_v48  ;;  %v313_v56 = vadd.f32 %v312_v49, %v303_v52 }
  0xb7   : > { %v314_v59 = vadd.f32 %v312_v49, %v310_v55  ;;  %v315_v60 = vmul.f32 %v313_v56, %v247_v57 }
  0xb9   : > { %v316_v61 = vmul.f32 %v314_v59, %v248_v58 }
  0xbb   : > { %v317_v62 = vadd.f32 %v316_v61, %v315_v60 }
  0xbd   : > { %318 = vadd.xlane.f32.xlu1 %v317_v62 }
 0x14a   : > { %v319_v15 = vpop.xlane.xlu1 %318 }
 0x14b   : > { %v320_v18 = vmul.f32 0.00390625, %v319_v15 }
 0x14d   : > { %v321_v19 = vmul.f32 %v320_v18, %v280_v16  ;;  %v322_v20 = vmul.f32 %v320_v18, %v281_v17 }
 0x14f   : > { %v329_v22 = vmul.f32 %v327_v14, %v321_v19  ;;  %v330_v23 = vmul.f32 %v327_v14, %v322_v20 }
 0x151   : > { %v333_v24 = vcombine.low %v329_v22, %v330_v23 }
 0x153   : > { %v335_v26 = vadd.f32 %v333_v24, %v564_v12 }
 0x155   : > { %v347_v27 = vadd.f32 %v345_v25, %v335_v26 }
 0x157   : > { %348 = vst [vmem:[%s211_s10] sm:$0xff] %v347_v27 }
 0x158 PF: > { %s15_s15 = sadd.s32 1, %s486_s15  }
 0x159   : > { %p12_p1 = scmp.ge.s32.totalorder %s15_s15, 4  }
 0x15b   :  { %14 = sbr.rel (!%p12_p1) target bundleno = 1 (0x1), region = 71 }
 0x162   :  { %370 = vsyncpa [#allocation3], 1 }
 0x163   :  { %372 = vsyncpa [#allocation3 + $0x1], 1 }

</bundles_post_ra>
